<compile_context>
chip_gen: v6e
topology: v6e:2x2x1
jax: 0.10.0
libtpu: 0.0.40
codegen_flags: <defaults>
</compile_context>

<pallas_src>
import jax
import jax.numpy as jnp
from jax.experimental import pallas as pl
from jax.experimental.pallas import tpu as pltpu


def word_avg_kernel(ids_ref, table_ref, w_ref, b_ref, out_ref):
    """Fused gather + seq-sum + fc.

    ids_ref:   (N, 1) int32, batch-major flattened token ids (n = b*S + s)
    table_ref: (V, D) fp32 embedding table
    w_ref:     (D, O) fp32 fc weight, already transposed AND pre-scaled by 1/S
    b_ref:     (1, O) fp32 fc bias
    out_ref:   (B, O) fp32 logits
    """
    N = ids_ref.shape[0]
    V = table_ref.shape[0]
    B = out_ref.shape[0]
    S = N // B

    ids = ids_ref[...]                                                    # (N, 1) int32

    # One-hot over the vocab (vocab on the lane axis). Column ids broadcast along lanes.
    vocab_ids = jax.lax.broadcasted_iota(jnp.int32, (N, V), 1)            # (N, V)
    onehot = (ids == vocab_ids).astype(jnp.float32)                       # (N, V)

    # Segment matrix: seg[b, n] = 1 iff token n belongs to batch row b (n in [b*S, (b+1)*S)).
    n_pos = jax.lax.broadcasted_iota(jnp.int32, (B, N), 1)
    b_pos = jax.lax.broadcasted_iota(jnp.int32, (B, N), 0)
    seg = ((n_pos >= b_pos * S) & (n_pos < (b_pos + 1) * S)).astype(jnp.float32)  # (B, N)

    # Fused embedding gather + sum over seq, entirely on the MXU:
    #   counts[b, v]  = #{s : text[s, b] == v}
    #   pooled_sum[b] = sum_s table[text[s, b]] = counts[b] @ table
    counts = jnp.dot(seg, onehot, preferred_element_type=jnp.float32)     # (B, V)
    pooled_sum = jnp.dot(counts, table_ref[...],
                         preferred_element_type=jnp.float32)              # (B, D) == S * mean

    # fc: the 1/S of avg_pool2d is already folded into w_ref, so this IS mean @ W^T + b.
    out = jnp.dot(pooled_sum, w_ref[...], preferred_element_type=jnp.float32)
    out_ref[...] = out + b_ref[...]                                       # (B, O)


def word_avg_forward(text, embed_table, fc_w_t, fc_b):
    """text: (S, B) int; embed_table: (V, D); fc_w_t: (D, O) = W^T of nn.Linear; fc_b: (O,)."""
    S, B = text.shape
    V, D = embed_table.shape
    O = fc_w_t.shape[1]
    N = S * B

    # Tiny host-side glue only (a few hundred bytes): flatten ids batch-major as a column
    # so the in-kernel one-hot is a natural lane broadcast, and fold the avg-pool 1/S into
    # the fc weight once.  No (S, B, D) embedding intermediate, no transpose of activations.
    ids = text.astype(jnp.int32).T.reshape(N, 1)                          # (N, 1)
    w_scaled = (fc_w_t * (1.0 / S)).astype(jnp.float32)                   # (D, O)
    bias = fc_b.reshape(1, O).astype(jnp.float32)                         # (1, O)

    return pl.pallas_call(
        word_avg_kernel,
        out_shape=jax.ShapeDtypeStruct((B, O), jnp.float32),
        grid=(1,),
        in_specs=[
            pl.BlockSpec((N, 1), lambda i: (0, 0)),   # token ids (full block)
            pl.BlockSpec((V, D), lambda i: (0, 0)),   # embedding table (VMEM resident)
            pl.BlockSpec((D, O), lambda i: (0, 0)),   # fc weight (pre-scaled by 1/S)
            pl.BlockSpec((1, O), lambda i: (0, 0)),   # fc bias
        ],
        out_specs=pl.BlockSpec((B, O), lambda i: (0, 0)),
        compiler_params=pltpu.CompilerParams(dimension_semantics=("arbitrary",)),
    )(ids, embed_table.astype(jnp.float32), w_scaled, bias)


if __name__ == "__main__":
    # Module hyper-parameters (small shapes consistent with the forward)
    vocab_size = 100
    embed_dim = 32
    output_dim = 4
    dropout_rate = 0.5  # identity at inference time
    seq_len = 8
    batch = 2

    key = jax.random.PRNGKey(0)
    k_text, k_emb, k_w, k_b = jax.random.split(key, 4)

    text = jax.random.randint(k_text, (seq_len, batch), 0, vocab_size, dtype=jnp.int32)
    embed_table = jax.random.normal(k_emb, (vocab_size, embed_dim), dtype=jnp.float32)
    fc_w = jax.random.normal(k_w, (output_dim, embed_dim), dtype=jnp.float32) * 0.1
    fc_b = jax.random.normal(k_b, (output_dim,), dtype=jnp.float32) * 0.1
    fc_w_t = fc_w.T  # (embed_dim, output_dim)

    out = word_avg_forward(text, embed_table, fc_w_t, fc_b)
    out = jax.block_until_ready(out)

    # Pure-JAX reference (same math as the PyTorch forward in eval mode):
    # embed -> permute(1,0,2) -> avg_pool over seq -> fc
    emb_ref = jnp.take(embed_table, text, axis=0)          # (S, B, D)
    pooled_ref = jnp.mean(emb_ref, axis=0)                 # (B, D) == mean over seq after permute
    ref = pooled_ref @ fc_w.T + fc_b                       # (B, O)

    assert out.shape == (batch, output_dim)
    # Slightly looser tolerance: the kernel's counts@table MXU path sums in a different
    # order than the XLA gather+mean reference.
    assert jnp.allclose(out, ref, atol=1e-4, rtol=1e-4), float(jnp.max(jnp.abs(out - ref)))

    print("KERNEL_OK")
</pallas_src>

<mosaic_0001>
module attributes {stable_mosaic.version = 11 : i64} {
  func.func @word_avg_kernel(%arg0: i32, %arg1: memref<16x1xi32, #tpu.memory_space<vmem>>, %arg2: memref<100x32xf32, #tpu.memory_space<vmem>>, %arg3: memref<32x4xf32, #tpu.memory_space<vmem>>, %arg4: memref<1x4xf32, #tpu.memory_space<vmem>>, %arg5: memref<2x4xf32, #tpu.memory_space<vmem>>) attributes {dimension_semantics = [#tpu.dimension_semantics<arbitrary>], iteration_bounds = array<i64: 1>, scalar_prefetch = 0 : i64, scratch_operands = 0 : i64, tpu.core_type = #tpu.core_type<tc>, window_params = [{pipeline_mode = #tpu.pipeline_mode<synchronous>, transform_indices = @transform_0, window_bounds = array<i64: 16, 1>}, {pipeline_mode = #tpu.pipeline_mode<synchronous>, transform_indices = @transform_1, window_bounds = array<i64: 100, 32>}, {pipeline_mode = #tpu.pipeline_mode<synchronous>, transform_indices = @transform_2, window_bounds = array<i64: 32, 4>}, {pipeline_mode = #tpu.pipeline_mode<synchronous>, transform_indices = @transform_3, window_bounds = array<i64: 1, 4>}, {pipeline_mode = #tpu.pipeline_mode<synchronous>, transform_indices = @transform_4, window_bounds = array<i64: 2, 4>}]} {
    %c0 = arith.constant 0 : index
    %c0_0 = arith.constant 0 : index
    %0 = vector.load %arg1[%c0, %c0_0] : memref<16x1xi32, #tpu.memory_space<vmem>>, vector<16x1xi32>
    %1 = tpu.iota {dimensions = array<i32: 1>} : vector<16x100xi32>
    %2 = vector.broadcast %0 : vector<16x1xi32> to vector<16x100xi32>
    %3 = arith.cmpi eq, %2, %1 : vector<16x100xi32>
    %4 = arith.extui %3 : vector<16x100xi1> to vector<16x100xi32>
    %5 = arith.sitofp %4 : vector<16x100xi32> to vector<16x100xf32>
    %6 = tpu.iota {dimensions = array<i32: 1>} : vector<2x16xi32>
    %7 = tpu.iota {dimensions = array<i32: 0>} : vector<2x16xi32>
    %c8_i32 = arith.constant 8 : i32
    %8 = vector.broadcast %c8_i32 : i32 to vector<2x16xi32>
    %9 = arith.muli %7, %8 : vector<2x16xi32>
    %10 = arith.cmpi sge, %6, %9 : vector<2x16xi32>
    %c1_i32 = arith.constant 1 : i32
    %11 = vector.broadcast %c1_i32 : i32 to vector<2x16xi32>
    %12 = arith.addi %7, %11 : vector<2x16xi32>
    %c8_i32_1 = arith.constant 8 : i32
    %13 = vector.broadcast %c8_i32_1 : i32 to vector<2x16xi32>
    %14 = arith.muli %12, %13 : vector<2x16xi32>
    %15 = arith.cmpi slt, %6, %14 : vector<2x16xi32>
    %16 = arith.andi %10, %15 : vector<2x16xi1>
    %17 = arith.extui %16 : vector<2x16xi1> to vector<2x16xi32>
    %18 = arith.sitofp %17 : vector<2x16xi32> to vector<2x16xf32>
    %cst = arith.constant dense<0.000000e+00> : vector<2x100xf32>
    %19 = tpu.matmul %18, %5, %cst {dimension_numbers = #tpu.dot_dimension_numbers<[1], [0], [0], [1], [0, 0, 1, 1], [], []>} : vector<2x16xf32>, vector<16x100xf32>, vector<2x100xf32> -> vector<2x100xf32>
    %c0_2 = arith.constant 0 : index
    %c0_3 = arith.constant 0 : index
    %20 = vector.load %arg2[%c0_2, %c0_3] : memref<100x32xf32, #tpu.memory_space<vmem>>, vector<100x32xf32>
    %cst_4 = arith.constant dense<0.000000e+00> : vector<2x32xf32>
    %21 = tpu.matmul %19, %20, %cst_4 {dimension_numbers = #tpu.dot_dimension_numbers<[1], [0], [0], [1], [0, 0, 1, 1], [], []>} : vector<2x100xf32>, vector<100x32xf32>, vector<2x32xf32> -> vector<2x32xf32>
    %c0_5 = arith.constant 0 : index
    %c0_6 = arith.constant 0 : index
    %22 = vector.load %arg3[%c0_5, %c0_6] : memref<32x4xf32, #tpu.memory_space<vmem>>, vector<32x4xf32>
    %cst_7 = arith.constant dense<0.000000e+00> : vector<2x4xf32>
    %23 = tpu.matmul %21, %22, %cst_7 {dimension_numbers = #tpu.dot_dimension_numbers<[1], [0], [0], [1], [0, 0, 1, 1], [], []>} : vector<2x32xf32>, vector<32x4xf32>, vector<2x4xf32> -> vector<2x4xf32>
    %c0_8 = arith.constant 0 : index
    %c0_9 = arith.constant 0 : index
    %24 = vector.load %arg4[%c0_8, %c0_9] : memref<1x4xf32, #tpu.memory_space<vmem>>, vector<1x4xf32>
    %25 = vector.broadcast %24 : vector<1x4xf32> to vector<2x4xf32>
    %26 = arith.addf %23, %25 : vector<2x4xf32>
    %c0_10 = arith.constant 0 : index
    %c0_11 = arith.constant 0 : index
    %27 = vector.load %arg5[%c0_10, %c0_11] : memref<2x4xf32, #tpu.memory_space<vmem>>, vector<2x4xf32>
    tpu.vector_store %arg5[%c0_10, %c0_11], %26 {strides = array<i32>} : memref<2x4xf32, #tpu.memory_space<vmem>>, vector<2x4xf32>,
    return
  }
  func.func @transform_0(%arg0: i32) -> (i32, i32) {
    %c0_i32 = arith.constant 0 : i32
    %c0_i32_0 = arith.constant 0 : i32
    %c0_i32_1 = arith.constant 0 : i32
    return %c0_i32, %c0_i32_0 : i32, i32
  }
  func.func @transform_1(%arg0: i32) -> (i32, i32) {
    %c0_i32 = arith.constant 0 : i32
    %c0_i32_0 = arith.constant 0 : i32
    %c0_i32_1 = arith.constant 0 : i32
    return %c0_i32, %c0_i32_0 : i32, i32
  }
  func.func @transform_2(%arg0: i32) -> (i32, i32) {
    %c0_i32 = arith.constant 0 : i32
    %c0_i32_0 = arith.constant 0 : i32
    %c0_i32_1 = arith.constant 0 : i32
    return %c0_i32, %c0_i32_0 : i32, i32
  }
  func.func @transform_3(%arg0: i32) -> (i32, i32) {
    %c0_i32 = arith.constant 0 : i32
    %c0_i32_0 = arith.constant 0 : i32
    %c0_i32_1 = arith.constant 0 : i32
    return %c0_i32, %c0_i32_0 : i32, i32
  }
  func.func @transform_4(%arg0: i32) -> (i32, i32) {
    %c0_i32 = arith.constant 0 : i32
    %c0_i32_0 = arith.constant 0 : i32
    %c0_i32_1 = arith.constant 0 : i32
    return %c0_i32, %c0_i32_0 : i32, i32
  }
}

</mosaic_0001>

<bundles_post_ra>
// kernel: tpu_custom_call.1
= control target key start
LH: loop header
LB: loop body
LE: loop exit
PB: predicated region body
PF: predicated region fallthrough
CT: control target
= control target key end

     0   :  { %v417_v1 = vmov 0   ;;  %v418_v2 = vmov 0.0   ;;  %s536_s0 = inlined_call_operand.vmem [shape: s32[16,1], index: 0, kind: input, shape index: {}]   ;;  %s537_s1 = inlined_call_operand.vmem [shape: f32[100,32], index: 1, kind: input, shape index: {}]   ;;  %s538_s2 = inlined_call_operand.vmem [shape: f32[32,4], index: 2, kind: input, shape index: {}]   ;;  %s539_s3 = inlined_call_operand.vmem [shape: f32[1,4], index: 3, kind: input, shape index: {}]   ;;  %s540_s4 = inlined_call_operand.hbm [shape: f32[2,4], index: 4, kind: output, shape index: {}]  }
   0x1   :  { %v19_v0 = vld [vmem:[%s536_s0 + $0x8] sm:$0xff]  ;;  %394 = vset.pattern.permute.xlu0 %v417_v1  ;;  %342 = vmatprep.subr.mxu0 %v418_v2 }
   0x2   :  { %9 = vsyncpa [#allocation3], 0  ;;  %26 = vperm.xlu0 %394, %v19_v0   ;;  %349 = vmatprep.subr.mxu1 %v418_v2  ;;  %v18_v3 = vld [vmem:[%s536_s0] sm:$0xff]  ;;  %vm419_vm0 = vmmov 0   ;;  %vm135_vm1 = vcmask 1043456   ;;  %v129_v5 = vld [vmem:[%s537_s1 + $0x58] sm:$0xff]  ;;  %v20_v16 = vlaneseq }
   0x3   :  { %346 = vmatprep.mubr.msk.f32.mxu0 %vm419_vm0, %v418_v2  ;;  %375 = vmatprep.mubr.msk.f32.mxu1 %vm419_vm0, %v418_v2  ;;  %v130_v4 = vld [vmem:[%s537_s1 + $0x60] sm:$0xf]  ;;  %v128_v6 = vld [vmem:[%s537_s1 + $0x50] sm:$0xff]  ;;  %v127_v7 = vld [vmem:[%s537_s1 + $0x48] sm:$0xff]  ;;  %v420_v23 = vmov 1.0   ;;  %vm44_vm6 = vcmask 130048  }
   0x4   :  { %350 = vmatpush3.msk.msra.mxu1 %vm135_vm1, %v130_v4  ;;  %v126_v8 = vld [vmem:[%s537_s1 + $0x40] sm:$0xff]  ;;  %v125_v9 = vld [vmem:[%s537_s1 + $0x38] sm:$0xff]  ;;  %v124_v10 = vld [vmem:[%s537_s1 + $0x30] sm:$0xff]  ;;  %v35_v17 = vshrl.u32 %v20_v16, 7  ;;  %v21_v21 = vand.u32 127, %v20_v16  ;;  %vm131_vm8 = vcmask 818176  }
   0x5   :  { %351 = vmatprep.subr.mxu1 %v418_v2  ;;  %v123_v11 = vld [vmem:[%s537_s1 + $0x28] sm:$0xff]  ;;  %v122_v12 = vld [vmem:[%s537_s1 + $0x20] sm:$0xff]  ;;  %v121_v13 = vld [vmem:[%s537_s1 + $0x18] sm:$0xff]  ;;  %vm220_vm9 = vcmask 261120   ;;  %s421_s26 = smov [#allocation2]   ;;  %vm294_vm10 = vcmask 25600  }
   0x6   :  { %23 = vperm.xlu0 %394, %v18_v3   ;;  %352 = vmatpush3.msra.mxu1 %v129_v5  ;;  %v120_v14 = vld [vmem:[%s537_s1 + $0x10] sm:$0xff]  ;;  %v119_v15 = vld [vmem:[%s537_s1 + $0x8] sm:$0xff]  ;;  %v38_v18 = vadd.s32 1, %v35_v17  ;;  %v36_v19 = vmul.u32 8, %v35_v17  ;;  %v118_v26 = vld [vmem:[%s537_s1] sm:$0xff]  ;;  %s302_s27 = sshll.u32 %s421_s26, 4  ;;  %s303_s27 = int_to_ptr.vmem [resolvable:$true] %s302_s27 }
   0x7   :  { %353 = vmatprep.subr.mxu1 %v418_v2  ;;  %v212_v27 = vld [vmem:[%s538_s2 + $0x18] sm:$0xff]  ;;  %v211_v28 = vld [vmem:[%s538_s2 + $0x10] sm:$0xff]  ;;  %v210_v29 = vld [vmem:[%s538_s2 + $0x8] sm:$0xff]  ;;  %s395_s28 = scalar_lea.vmem %s303_s27, 32  ;;  %p400_p1 = scmp.lt.s32.totalorder %s303_s27, %s303_s27 }
   0x8   :  { %354 = vmatpush3.msra.mxu1 %v128_v6  ;;  %v39_v20 = vmul.u32 8, %v38_v18  ;;  %vm37_vm2 = vcmp.ge.s32.totalorder %v21_v21, %v36_v19  ;;  %v209_v32 = vld [vmem:[%s538_s2] sm:$0xff]  ;;  %p396_p0 = scmp.ne.s32.totalorder %s303_s27, %s395_s28  ;;  %p401_p2 = scmp.lt.s32.totalorder %s395_s28, %s395_s28 }
   0x9   :  { %355 = vmatprep.subr.mxu1 %v418_v2  ;;  %v318_v35 = vld [vmem:[%s539_s3] ss:$0 sm:$0xff] }
   0xa   :  { %356 = vmatpush3.msra.mxu1 %v127_v7  ;;  %vm40_vm3 = vcmp.lt.s32.totalorder %v21_v21, %v39_v20  ;;  %p402_p3 = por %p401_p2, %p400_p1 }
   0xb   :  { %357 = vmatprep.subr.mxu1 %v418_v2  ;;  %vm41_vm5 = vmand %vm37_vm2, %vm40_vm3 }
   0xc   :  { %358 = vmatpush3.msra.mxu1 %v126_v8  ;;  %v312_v25 = vsel %vm41_vm5, 1.0, %v418_v2  ;;  %p403_p4 = pnand %p402_p3, %p396_p0 }
   0xd   :  { %359 = vmatprep.subr.mxu1 %v418_v2 }
   0xe   :  { %360 = vmatpush3.msra.mxu1 %v125_v9 }
   0xf   :  { %361 = vmatprep.subr.mxu1 %v418_v2 }
  0x10   :  { %362 = vmatpush3.msra.mxu1 %v124_v10 }
  0x11   :  { %363 = vmatprep.subr.mxu1 %v418_v2 }
  0x12   :  { %364 = vmatpush3.msra.mxu1 %v123_v11 }
  0x13   :  { %365 = vmatprep.subr.mxu1 %v418_v2 }
  0x14   :  { %366 = vmatpush3.msra.mxu1 %v122_v12 }
  0x15   :  { %367 = vmatprep.subr.mxu1 %v418_v2 }
  0x16   :  { %368 = vmatpush3.msra.mxu1 %v121_v13 }
  0x17   :  { %369 = vmatprep.subr.mxu1 %v418_v2 }
  0x18   :  { %370 = vmatpush3.msra.mxu1 %v120_v14 }
  0x19   :  { %371 = vmatprep.subr.mxu1 %v418_v2 }
  0x1a   :  { %372 = vmatpush3.msra.mxu1 %v119_v15 }
  0x1b   :  { %373 = vmatprep.subr.mxu1 %v418_v2 }
  0x1c   :  { %374 = vmatpush3.msra.mxu1 %v118_v26 }
  0x7d   :  { %v27_v22 = vpop.permute.xlu0 %26 }
  0x7e   :  { %vm29_vm4 = vcmp.eq.s32.totalorder %v27_v22, %v21_v21 }
  0x7f   :  { %343 = vmatpush3.msk.msra.mxu0 %vm29_vm4, %v420_v23 }
  0x80   :  { %344 = vmatprep.subr.mxu0 %v418_v2 }
  0x81   :  { %v24_v24 = vpop.permute.xlu0 %23 }
  0x82   :  { %vm28_vm7 = vcmp.eq.s32.totalorder %v24_v24, %v21_v21 }
  0x83   :  { %345 = vmatpush3.msk.msra.mxu0 %vm28_vm7, %v420_v23 }
  0x84   :  { %347 = vmatmul.mubr.msk.f32.vlgmr.msra.gmra.mxu0 %vm44_vm6, %v312_v25  ;;  %378 = vmatprep.subr.mxu0 %v418_v2 }
  0x85   :  { %386 = vmatprep.mubr.msk.f32.mxu0 %vm419_vm0, %v418_v2  ;;  %379 = vmatpush3.msra.mxu0 %v212_v27 }
  0x86   :  { %380 = vmatprep.subr.mxu0 %v418_v2 }
  0x87   :  { %381 = vmatpush3.msra.mxu0 %v211_v28 }
  0x88   :  { %382 = vmatprep.subr.mxu0 %v418_v2 }
  0x89   :  { %383 = vmatpush3.msra.mxu0 %v210_v29 }
  0x8a   :  { %384 = vmatprep.subr.mxu0 %v418_v2 }
  0x8b   :  { %385 = vmatpush3.msra.mxu0 %v209_v32 }
 0x144   :  { %v114_v30 = vpop.f32.mrf.mxu0 }
 0x145   :  { %376 = vmatmul.mubr.msk.f32.vlgmr.msra.gmra.mxu1 %vm131_vm8, %v114_v30 }
 0x146   :  { %v348_v31 = vpop.f32.mrf.mxu0 }
 0x205   :  { %v205_v33 = vpop.f32.mrf.mxu1 }
 0x206   :  { %387 = vmatmul.mubr.msk.f32.vlgmr.msra.gmra.mxu0 %vm220_vm9, %v205_v33 }
 0x207   :  { %v377_v34 = vpop.f32.mrf.mxu1 }
 0x2c6   :  { %v290_v36 = vpop.f32.mrf.mxu0 }
 0x2c7   :  { %v291_v37 = vadd.f32 %v318_v35, %v290_v36 }
 0x2c8   :  { %v388_v38 = vpop.f32.mrf.mxu0 }
 0x2c9   :  { %295 = vst.msk [vmem:[#allocation2] sm:$0x3] %vm294_vm10, %v291_v37 }
 0x2ca   :  { %406 = shalt.err (!%p403_p4)
}
 0x2cb   :  { %305 = dma.vmem_to_hbm [thread:$0]  %s303_s27, 32, %s540_s4, [#allocation3]  }
 0x2cc   :  { %415 = dma.done.wait [#allocation3], 32  }
 0x2cd   :  { %416 = vsyncadd [#allocation3], 4294967264 }
 0x2ce   :  { %309 = vsyncpa [#allocation3], 1 }

</bundles_post_ra>
